<compile_context>
chip_gen: v5e
topology: v5e:2x2
jax: 0.10.0
libtpu: 0.0.40
codegen_flags: <defaults>
</compile_context>

<pallas_src>
import jax
import jax.numpy as jnp
from jax import lax
from jax.experimental import pallas as pl
from jax.experimental.pallas import tpu as pltpu

EPS = 1e-5
MXU_DTYPE = jnp.bfloat16          # MXU operand dtype (f32 accumulation everywhere)


# ----------------------------------------------------------------------------
# host-side helpers
# ----------------------------------------------------------------------------
def _pick_row_tile(m, lo=8, hi=2048):
    """Largest multiple-of-8 divisor of m in [lo, min(hi, m//2)]; fallback m."""
    target = min(hi, max(lo, m // 2))
    best = 0
    t = lo
    while t <= target:
        if m % t == 0:
            best = t
        t += lo
    return best if best > 0 else m


def _vmem_limit_bytes(per_step_bytes):
    """Per-generation VMEM budget: double-buffered blocks + in-kernel
    temporaries + headroom, capped at 3/4 of this chip's physical VMEM
    (~48 MiB on v7x, ~96 MiB on v5e/v6e)."""
    cap = 128 * 1024 * 1024
    try:
        info_cap = int(getattr(pltpu.get_tpu_info(), "vmem_capacity_bytes", cap))
        if info_cap > 0:
            cap = info_cap
    except Exception:
        pass
    want = int(2.5 * per_step_bytes) + (8 << 20)
    return int(max(16 << 20, min(want, (cap * 3) // 4)))


def _compiler_params(per_step_bytes):
    return pltpu.CompilerParams(
        dimension_semantics=("parallel",),
        vmem_limit_bytes=_vmem_limit_bytes(per_step_bytes))


def _bn_scale_shift(stats, rows_per_tile, total_rows, gamma, beta):
    """Combine per-tile (sum, centered sum of squares) into BN scale/shift.

    Chan's parallel-variance combine (numerically stable):
      mean = sum_t(sum_t)/M
      M2   = sum_t(css_t) + n * sum_t((mean_t - mean)^2)
      var  = M2 / M                      (biased, as in train-mode BatchNorm)
      scale = gamma * rsqrt(var + eps);  shift = beta - mean * scale
    """
    sums = stats[:, 0, :]
    css = stats[:, 1, :]
    mean = jnp.sum(sums, axis=0, keepdims=True) / total_rows
    tile_mean = sums / rows_per_tile
    m2 = (jnp.sum(css, axis=0, keepdims=True)
          + rows_per_tile * jnp.sum((tile_mean - mean) ** 2, axis=0, keepdims=True))
    var = m2 / total_rows
    scale = gamma * lax.rsqrt(var + EPS)
    shift = beta - mean * scale
    return scale, shift


# ----------------------------------------------------------------------------
# in-kernel helpers / kernels
# ----------------------------------------------------------------------------
def _tile_stats(z, inv_rows):
    """Per-tile sum and centered sum of squares over axis 0 (both (1, C))."""
    s = jnp.sum(z, axis=0, keepdims=True)
    d = z - s * inv_rows
    css = jnp.sum(d * d, axis=0, keepdims=True)
    return s, css


def _make_conv1_ds_kernel(cout, inv_rows):
    def kernel(x_ref, wd1_ref, hd_ref, h1_ref, st_ref):
        # Fused 1x1 contractions: downsample conv (first `cout` cols) + conv1
        # (last P cols) in a single MXU dot; bf16 operands, f32 accumulation.
        hd1 = jnp.dot(x_ref[...], wd1_ref[...],
                      preferred_element_type=jnp.float32)        # (TM, cout+P) f32
        s, css = _tile_stats(hd1, inv_rows)
        st_ref[pl.ds(0, 1), :] = s
        st_ref[pl.ds(1, 1), :] = css
        hd_ref[...] = hd1[:, :cout]                              # raw residual
        h1_ref[...] = hd1[:, cout:]                              # raw conv1 out
    return kernel


def _make_conv2_kernel(H, W, P, rate):
    HW = H * W
    inv_rows = 1.0 / HW

    def kernel(h1_ref, s1_ref, t1_ref, w2_ref, h2_ref, st_ref):
        # BN1 (precomputed per-channel scale/shift) + ReLU on one image.
        h1 = jnp.maximum(h1_ref[...] * s1_ref[...] + t1_ref[...], 0.0)   # (HW,P) f32

        # Dilated 3x3 taps on the flattened (HW, P) slab: XLU sublane rolls
        # masked with boundary masks from a hoisted 2D iota (no zero-padded
        # scratch, no 4D reshape/zeros/concat per tap).
        rows = lax.broadcasted_iota(jnp.int32, (HW, 1), 0)
        yy = rows // W
        xx = rows % W
        taps = []
        for ky in range(3):
            dy = (ky - 1) * rate
            y_ok = jnp.logical_and(yy + dy >= 0, yy + dy < H)
            for kx in range(3):
                dx = (kx - 1) * rate
                x_ok = jnp.logical_and(xx + dx >= 0, xx + dx < W)
                ok = jnp.logical_and(y_ok, x_ok)
                d = dy * W + dx
                shift = (-d) % HW
                t = h1 if shift == 0 else pltpu.roll(h1, shift=shift, axis=0)
                taps.append(jnp.where(ok, t, 0.0).astype(MXU_DTYPE))
        im2col = jnp.concatenate(taps, axis=1)                   # (HW, 9P) bf16
        h2 = jnp.dot(im2col, w2_ref[...],
                     preferred_element_type=jnp.float32)         # (HW, P) f32

        s, css = _tile_stats(h2, inv_rows)
        st_ref[pl.ds(0, 1), :] = s
        st_ref[pl.ds(1, 1), :] = css
        h2_ref[...] = h2
    return kernel


def _make_conv3_kernel(inv_rows):
    def kernel(h2_ref, s2_ref, t2_ref, w3_ref, h3_ref, st_ref):
        h2 = jnp.maximum(h2_ref[...] * s2_ref[...] + t2_ref[...], 0.0)   # BN2+ReLU
        h3 = jnp.dot(h2.astype(MXU_DTYPE), w3_ref[...],
                     preferred_element_type=jnp.float32)         # (TM, Cout) f32
        s, css = _tile_stats(h3, inv_rows)
        st_ref[pl.ds(0, 1), :] = s
        st_ref[pl.ds(1, 1), :] = css
        h3_ref[...] = h3
    return kernel


def _final_kernel(h3_ref, hd_ref, s3_ref, t3_ref, sd_ref, td_ref, out_ref):
    # bn3(main) + bn_d(residual) + ReLU.  Residual normalization is deferred
    # to this pass so the residual is never held live across conv2/conv3.
    main = h3_ref[...] * s3_ref[...] + t3_ref[...]
    res = hd_ref[...] * sd_ref[...] + td_ref[...]
    out_ref[...] = jnp.maximum(main + res, 0.0)


# ----------------------------------------------------------------------------
# wrapper
# ----------------------------------------------------------------------------
def astrous_bottleneck(x_nhwc, params, rate):
    N, H, W, Cin = x_nhwc.shape
    P = params["w1"].shape[1]
    Cout = 4 * P
    C1 = Cout + P
    HW = H * W
    M = N * HW
    f32 = jnp.float32

    # Lane-aligned column split of the fused conv1+downsample dot and
    # lane-dense final stores both assume this (true for DeepLab channels).
    assert Cout % 128 == 0, "Cout (= 4 * planes) must be a multiple of 128"

    TM = _pick_row_tile(M)
    n_tiles = M // TM

    # MXU operands in bf16 (f32 accumulation via preferred_element_type).
    x2d = x_nhwc.reshape(M, Cin).astype(MXU_DTYPE)
    wd1 = jnp.concatenate([params["wd"], params["w1"]], axis=1).astype(MXU_DTYPE)
    w2f = params["w2"].reshape(9 * P, P).astype(MXU_DTYPE)        # (ky,kx,ci) major
    w3 = params["w3"].astype(MXU_DTYPE)

    # ---- pass 1: fused conv1(1x1) + downsample(1x1) + BN1/BNd stats --------
    p1_bytes = (TM * Cin * 2 + Cin * C1 * 2 + TM * C1 * 4
                + TM * Cout * 4 + TM * P * 4 + 2 * C1 * 4)
    hd_raw, h1_raw, st1d = pl.pallas_call(
        _make_conv1_ds_kernel(Cout, 1.0 / TM),
        grid=(n_tiles,),
        in_specs=[pl.BlockSpec((TM, Cin), lambda i: (i, 0)),
                  pl.BlockSpec((Cin, C1), lambda i: (0, 0))],
        out_specs=[pl.BlockSpec((TM, Cout), lambda i: (i, 0)),
                   pl.BlockSpec((TM, P), lambda i: (i, 0)),
                   pl.BlockSpec((None, 2, C1), lambda i: (i, 0, 0))],
        out_shape=[jax.ShapeDtypeStruct((M, Cout), f32),
                   jax.ShapeDtypeStruct((M, P), f32),
                   jax.ShapeDtypeStruct((n_tiles, 2, C1), f32)],
        compiler_params=_compiler_params(p1_bytes),
        cost_estimate=pl.CostEstimate(
            flops=2 * M * Cin * C1, transcendentals=0,
            bytes_accessed=M * Cin * 2 + Cin * C1 * 2 + M * C1 * 4),
    )(x2d, wd1)

    scale_d, shift_d = _bn_scale_shift(st1d[:, :, :Cout], TM, M,
                                       params["gd"], params["bd"])
    scale_1, shift_1 = _bn_scale_shift(st1d[:, :, Cout:], TM, M,
                                       params["g1"], params["b1"])

    # ---- pass 2: dilated 3x3 conv per image (no halo) + BN2 stats ----------
    h1_img = h1_raw.reshape(N, HW, P)
    p2_bytes = (2 * HW * P * 4 + 9 * P * P * 2 + 4 * HW * 9 * P * 2 + 4 * P * 4)
    h2_raw, st2 = pl.pallas_call(
        _make_conv2_kernel(H, W, P, rate),
        grid=(N,),
        in_specs=[pl.BlockSpec((None, HW, P), lambda n: (n, 0, 0)),
                  pl.BlockSpec((1, P), lambda n: (0, 0)),
                  pl.BlockSpec((1, P), lambda n: (0, 0)),
                  pl.BlockSpec((9 * P, P), lambda n: (0, 0))],
        out_specs=[pl.BlockSpec((None, HW, P), lambda n: (n, 0, 0)),
                   pl.BlockSpec((None, 2, P), lambda n: (n, 0, 0))],
        out_shape=[jax.ShapeDtypeStruct((N, HW, P), f32),
                   jax.ShapeDtypeStruct((N, 2, P), f32)],
        compiler_params=_compiler_params(p2_bytes),
        cost_estimate=pl.CostEstimate(
            flops=2 * M * 9 * P * P, transcendentals=0,
            bytes_accessed=2 * M * P * 4 + 9 * P * P * 2),
    )(h1_img, scale_1, shift_1, w2f)

    scale_2, shift_2 = _bn_scale_shift(st2, HW, M, params["g2"], params["b2"])

    # ---- pass 3: conv3 (1x1) + BN3 stats ------------------------------------
    h2_2d = h2_raw.reshape(M, P)
    p3_bytes = (2 * TM * P * 4 + P * Cout * 2 + 2 * TM * Cout * 4
                + 2 * Cout * 4 + 4 * P * 4)
    h3_raw, st3 = pl.pallas_call(
        _make_conv3_kernel(1.0 / TM),
        grid=(n_tiles,),
        in_specs=[pl.BlockSpec((TM, P), lambda i: (i, 0)),
                  pl.BlockSpec((1, P), lambda i: (0, 0)),
                  pl.BlockSpec((1, P), lambda i: (0, 0)),
                  pl.BlockSpec((P, Cout), lambda i: (0, 0))],
        out_specs=[pl.BlockSpec((TM, Cout), lambda i: (i, 0)),
                   pl.BlockSpec((None, 2, Cout), lambda i: (i, 0, 0))],
        out_shape=[jax.ShapeDtypeStruct((M, Cout), f32),
                   jax.ShapeDtypeStruct((n_tiles, 2, Cout), f32)],
        compiler_params=_compiler_params(p3_bytes),
        cost_estimate=pl.CostEstimate(
            flops=2 * M * P * Cout, transcendentals=0,
            bytes_accessed=M * P * 4 + M * Cout * 4 + P * Cout * 2),
    )(h2_2d, scale_2, shift_2, w3)

    scale_3, shift_3 = _bn_scale_shift(st3, TM, M, params["g3"], params["b3"])

    # ---- pass 4: BN3 + BNd apply, residual add, final ReLU ------------------
    p4_bytes = 3 * TM * Cout * 4 + 4 * Cout * 4
    out2d = pl.pallas_call(
        _final_kernel,
        grid=(n_tiles,),
        in_specs=[pl.BlockSpec((TM, Cout), lambda i: (i, 0)),
                  pl.BlockSpec((TM, Cout), lambda i: (i, 0)),
                  pl.BlockSpec((1, Cout), lambda i: (0, 0)),
                  pl.BlockSpec((1, Cout), lambda i: (0, 0)),
                  pl.BlockSpec((1, Cout), lambda i: (0, 0)),
                  pl.BlockSpec((1, Cout), lambda i: (0, 0))],
        out_specs=pl.BlockSpec((TM, Cout), lambda i: (i, 0)),
        out_shape=jax.ShapeDtypeStruct((M, Cout), f32),
        compiler_params=_compiler_params(p4_bytes),
        cost_estimate=pl.CostEstimate(
            flops=6 * M * Cout, transcendentals=0,
            bytes_accessed=3 * M * Cout * 4),
    )(h3_raw, hd_raw, scale_3, shift_3, scale_d, shift_d)

    return out2d.reshape(N, H, W, Cout)


# ----------------------------------------------------------------------------
# pure-JAX reference (f32, same train-mode BN semantics as the PyTorch module)
# ----------------------------------------------------------------------------
def reference(x_nhwc, params, rate):
    def bn(y, g, b):
        mean = jnp.mean(y, axis=(0, 1, 2), keepdims=True)
        var = jnp.mean((y - mean) ** 2, axis=(0, 1, 2), keepdims=True)
        return ((y - mean) / jnp.sqrt(var + EPS)
                * g.reshape(1, 1, 1, -1) + b.reshape(1, 1, 1, -1))

    dn = ('NHWC', 'HWIO', 'NHWC')
    h = jnp.einsum('nhwc,cp->nhwp', x_nhwc, params["w1"])
    h = jax.nn.relu(bn(h, params["g1"], params["b1"]))
    h = lax.conv_general_dilated(h, params["w2"], window_strides=(1, 1),
                                 padding=((rate, rate), (rate, rate)),
                                 rhs_dilation=(rate, rate),
                                 dimension_numbers=dn)
    h = jax.nn.relu(bn(h, params["g2"], params["b2"]))
    h = jnp.einsum('nhwp,pq->nhwq', h, params["w3"])
    h = bn(h, params["g3"], params["b3"])
    res = jnp.einsum('nhwc,cq->nhwq', x_nhwc, params["wd"])
    res = bn(res, params["gd"], params["bd"])
    return jax.nn.relu(h + res)


if __name__ == "__main__":
    # Module config: inplanes=64, planes=32 (expansion=4 -> 128 out channels),
    # stride=1, rate=2, downsample=True.  Cout=128 keeps the output slab
    # lane-dense, as for real DeepLab channel counts.
    N, Cin, H, W = 2, 64, 16, 16
    planes, rate = 32, 2
    Cout = 4 * planes
    f32 = jnp.float32

    key = jax.random.PRNGKey(0)
    ks = jax.random.split(key, 13)
    params = {
        "w1": 0.2 * jax.random.normal(ks[0], (Cin, planes), f32),
        "w2": 0.2 * jax.random.normal(ks[1], (3, 3, planes, planes), f32),
        "w3": 0.2 * jax.random.normal(ks[2], (planes, Cout), f32),
        "wd": 0.2 * jax.random.normal(ks[3], (Cin, Cout), f32),
        "g1": 1.0 + 0.1 * jax.random.normal(ks[4], (1, planes), f32),
        "b1": 0.1 * jax.random.normal(ks[5], (1, planes), f32),
        "g2": 1.0 + 0.1 * jax.random.normal(ks[6], (1, planes), f32),
        "b2": 0.1 * jax.random.normal(ks[7], (1, planes), f32),
        "g3": 1.0 + 0.1 * jax.random.normal(ks[8], (1, Cout), f32),
        "b3": 0.1 * jax.random.normal(ks[9], (1, Cout), f32),
        "gd": 1.0 + 0.1 * jax.random.normal(ks[10], (1, Cout), f32),
        "bd": 0.1 * jax.random.normal(ks[11], (1, Cout), f32),
    }

    # Input in PyTorch NCHW convention, transposed to kernel NHWC layout.
    x_nchw = jax.random.normal(ks[12], (N, Cin, H, W), f32)
    x_nhwc = jnp.transpose(x_nchw, (0, 2, 3, 1))

    out = astrous_bottleneck(x_nhwc, params, rate)
    out = jax.block_until_ready(out)

    ref = reference(x_nhwc, params, rate)
    err = float(jnp.max(jnp.abs(out - ref)))
    scale = float(jnp.max(jnp.abs(ref))) + 1e-6
    assert out.shape == (N, H, W, Cout), out.shape
    # bf16 MXU operands -> compare in relative error of the output range.
    assert err <= 5e-2 * scale, f"err too large: abs={err}, rel={err / scale}"
    print("KERNEL_OK")
</pallas_src>

<mosaic_0001>
module attributes {stable_mosaic.version = 11 : i64} {
  func.func @kernel(%arg0: i32, %arg1: memref<256x64xbf16, #tpu.memory_space<vmem>>, %arg2: memref<64x160xbf16, #tpu.memory_space<vmem>>, %arg3: memref<256x128xf32, #tpu.memory_space<vmem>>, %arg4: memref<256x32xf32, #tpu.memory_space<vmem>>, %arg5: memref<1x2x160xf32, #tpu.memory_space<vmem>>) attributes {dimension_semantics = [#tpu.dimension_semantics<parallel>], iteration_bounds = array<i64: 2>, scalar_prefetch = 0 : i64, scratch_operands = 0 : i64, tpu.core_type = #tpu.core_type<tc>, window_params = [{transform_indices = @transform_0, window_bounds = array<i64: 256, 64>}, {pipeline_mode = #tpu.pipeline_mode<synchronous>, transform_indices = @transform_1, window_bounds = array<i64: 64, 160>}, {transform_indices = @transform_2, window_bounds = array<i64: 256, 128>}, {transform_indices = @transform_3, window_bounds = array<i64: 256, 32>}, {transform_indices = @transform_4, window_bounds = array<i64: 1, 2, 160>}]} {
    %c0 = arith.constant 0 : index
    %c0_0 = arith.constant 0 : index
    %0 = vector.load %arg1[%c0, %c0_0] : memref<256x64xbf16, #tpu.memory_space<vmem>>, vector<256x64xbf16>
    %c0_1 = arith.constant 0 : index
    %c0_2 = arith.constant 0 : index
    %1 = vector.load %arg2[%c0_1, %c0_2] : memref<64x160xbf16, #tpu.memory_space<vmem>>, vector<64x160xbf16>
    %cst = arith.constant dense<0.000000e+00> : vector<256x160xf32>
    %2 = tpu.matmul %0, %1, %cst {dimension_numbers = #tpu.dot_dimension_numbers<[1], [0], [0], [1], [0, 0, 1, 1], [], []>} : vector<256x64xbf16>, vector<64x160xbf16>, vector<256x160xf32> -> vector<256x160xf32>
    %cst_3 = arith.constant dense<0.000000e+00> : vector<160xf32>
    %3 = vector.multi_reduction <add>, %2, %cst_3 [0] : vector<256x160xf32> to vector<160xf32>
    %4 = vector.shape_cast %3 : vector<160xf32> to vector<1x160xf32>
    %cst_4 = arith.constant 3.906250e-03 : f32
    %5 = vector.broadcast %cst_4 : f32 to vector<1x160xf32>
    %6 = arith.mulf %4, %5 : vector<1x160xf32>
    %7 = vector.broadcast %6 : vector<1x160xf32> to vector<256x160xf32>
    %8 = arith.subf %2, %7 : vector<256x160xf32>
    %9 = arith.mulf %8, %8 : vector<256x160xf32>
    %cst_5 = arith.constant dense<0.000000e+00> : vector<160xf32>
    %10 = vector.multi_reduction <add>, %9, %cst_5 [0] : vector<256x160xf32> to vector<160xf32>
    %11 = vector.shape_cast %10 : vector<160xf32> to vector<1x160xf32>
    %c0_6 = arith.constant 0 : index
    %c0_7 = arith.constant 0 : index
    %c0_8 = arith.constant 0 : index
    %12 = vector.load %arg5[%c0_6, %c0_7, %c0_8] : memref<1x2x160xf32, #tpu.memory_space<vmem>>, vector<1x1x160xf32>
    %13 = vector.shape_cast %12 : vector<1x1x160xf32> to vector<1x160xf32>
    %14 = vector.shape_cast %4 : vector<1x160xf32> to vector<1x1x160xf32>
    tpu.vector_store %arg5[%c0_6, %c0_7, %c0_8], %14 {strides = array<i32>} : memref<1x2x160xf32, #tpu.memory_space<vmem>>, vector<1x1x160xf32>,
    %c0_9 = arith.constant 0 : index
    %c1 = arith.constant 1 : index
    %c0_10 = arith.constant 0 : index
    %15 = vector.load %arg5[%c0_9, %c1, %c0_10] : memref<1x2x160xf32, #tpu.memory_space<vmem>>, vector<1x1x160xf32>
    %16 = vector.shape_cast %15 : vector<1x1x160xf32> to vector<1x160xf32>
    %17 = vector.shape_cast %11 : vector<1x160xf32> to vector<1x1x160xf32>
    tpu.vector_store %arg5[%c0_9, %c1, %c0_10], %17 {strides = array<i32>} : memref<1x2x160xf32, #tpu.memory_space<vmem>>, vector<1x1x160xf32>,
    %18 = vector.extract_strided_slice %2 {offsets = [0, 0], sizes = [256, 128], strides = [1, 1]} : vector<256x160xf32> to vector<256x128xf32>
    %c0_11 = arith.constant 0 : index
    %c0_12 = arith.constant 0 : index
    %19 = vector.load %arg3[%c0_11, %c0_12] : memref<256x128xf32, #tpu.memory_space<vmem>>, vector<256x128xf32>
    tpu.vector_store %arg3[%c0_11, %c0_12], %18 {strides = array<i32>} : memref<256x128xf32, #tpu.memory_space<vmem>>, vector<256x128xf32>,
    %20 = vector.extract_strided_slice %2 {offsets = [0, 128], sizes = [256, 32], strides = [1, 1]} : vector<256x160xf32> to vector<256x32xf32>
    %c0_13 = arith.constant 0 : index
    %c0_14 = arith.constant 0 : index
    %21 = vector.load %arg4[%c0_13, %c0_14] : memref<256x32xf32, #tpu.memory_space<vmem>>, vector<256x32xf32>
    tpu.vector_store %arg4[%c0_13, %c0_14], %20 {strides = array<i32>} : memref<256x32xf32, #tpu.memory_space<vmem>>, vector<256x32xf32>,
    return
  }
  func.func @transform_0(%arg0: i32) -> (i32, i32) {
    %c0_i32 = arith.constant 0 : i32
    %c0_i32_0 = arith.constant 0 : i32
    return %arg0, %c0_i32 : i32, i32
  }
  func.func @transform_1(%arg0: i32) -> (i32, i32) {
    %c0_i32 = arith.constant 0 : i32
    %c0_i32_0 = arith.constant 0 : i32
    %c0_i32_1 = arith.constant 0 : i32
    return %c0_i32, %c0_i32_0 : i32, i32
  }
  func.func @transform_2(%arg0: i32) -> (i32, i32) {
    %c0_i32 = arith.constant 0 : i32
    %c0_i32_0 = arith.constant 0 : i32
    return %arg0, %c0_i32 : i32, i32
  }
  func.func @transform_3(%arg0: i32) -> (i32, i32) {
    %c0_i32 = arith.constant 0 : i32
    %c0_i32_0 = arith.constant 0 : i32
    return %arg0, %c0_i32 : i32, i32
  }
  func.func @transform_4(%arg0: i32) -> (i32, i32, i32) {
    %c0_i32 = arith.constant 0 : i32
    %c0_i32_0 = arith.constant 0 : i32
    %c0_i32_1 = arith.constant 0 : i32
    return %arg0, %c0_i32, %c0_i32_0 : i32, i32, i32
  }
}

</mosaic_0001>

<bundles_post_ra>
// kernel: tpu_custom_call.1
= control target key start
LH: loop header
LB: loop body
LE: loop exit
PB: predicated region body
PF: predicated region fallthrough
CT: control target
= control target key end

     0   :  { %10 = vsyncpa [#allocation3], 0  ;;  %s2344_s0 = inlined_call_operand.vmem [shape: bf16[512,64], index: 0, kind: input, shape index: {}]   ;;  %s2345_s1 = inlined_call_operand.vmem [shape: bf16[64,160], index: 1, kind: input, shape index: {}]   ;;  %s2346_s2 = inlined_call_operand.hbm [shape: f32[512,128], index: 2, kind: output, shape index: {0}]   ;;  %s2347_s3 = inlined_call_operand.vmem [shape: f32[512,32], index: 3, kind: output, shape index: {1}]   ;;  %s2348_s4 = inlined_call_operand.hbm [shape: f32[2,2,160], index: 4, kind: output, shape index: {2}]  }
   0x1   :  { %12 = vsyncpa [#allocation3 + $0x1], 0 }
   0x2   :  { %13 = vsyncpa [#allocation5], 0 }
   0x3   :  { %15 = vsyncpa [#allocation5 + $0x1], 0  ;;  %s1551_s15 = smov 0   ;;  %s1553_s16 = smov 0  }
   0x4   :  { %s1555_s17 = smov 0   ;;  %s1557_s18 = smov 0  }
   0x5 LB: > { %s1572_s19 = sadd.s32 4294967295, %s1522_s18   ;;  %s1201_s20 = sadd.s32 4294967294, %s1522_s18   ;;  %s1522_s18 = sphi %s1557_s18, %s2407_s18   ;;  %s1518_s17 = sphi %s1555_s17, %s2406_s17   ;;  %s1514_s16 = sphi %s1553_s16, %s2405_s16   ;;  %s1510_s15 = sphi %s1551_s15, %s2404_s15  }
   0x6   : > { %s1576_s21 = sadd.s32 1, %s1522_s18   ;;  %s75_s22 = sadd.s32 1, %s1518_s17 }
   0x7   : > { %s72_s23 = ssub.s32 %s1522_s18, %s1576_s21  ;;  %p85_p0 = scmp.ne.s32.totalorder %s1518_s17, %s1514_s16 }
   0x8   : > { %p73_p1 = scmp.eq.s32.totalorder %s72_s23, 0  ;;  %p86_p2 = scmp.eq.s32.totalorder %s1572_s19, 1 }
   0x9   : > { %p91_p3 = scmp.ne.s32.totalorder %s1514_s16, %s1510_s15  ;;  %p92_p4 = scmp.eq.s32.totalorder %s1201_s20, 1 }
   0xa   : > { %s1587_s24 = scalar_select %p73_p1, %s1518_s17, %s75_s22  }
   0xb   : > { %p1589_p5 = por %p86_p2, %p85_p0  ;;  %p1593_p6 = por %p92_p4, %p91_p3 }
   0xc   : > { %p1204_p7 = scmp.ge.s32.totalorder %s1522_s18, 1  ;;  %p174_p8 = scmp.lt.s32.totalorder %s1522_s18, 3 }
   0xe   : > { %p175_p9 = pnand %p1204_p7, %p174_p8 }
  0x10   : > { %178 = sbr.rel (%p175_p9) target bundleno = 435 (0x1b3), region = 28 }
  0x15   : > { %v1301_v0 = vld [vmem:[%s2345_s1 + $0x30] sm:$0xf]  ;;  %v1371_v1 = vld [vmem:[%s2345_s1 + $0x34] sm:$0xf0]  ;;  %v1370_v2 = vld [vmem:[%s2345_s1 + $0x34] sm:$0xf] }
  0x16   : > { %v1302_v3 = vor.u32 %v1371_v1, %v1301_v0  ;;  %v1303_v4 = vld [vmem:[%s2345_s1 + $0x38] sm:$0xf0]  ;;  %v1293_v5 = vld [vmem:[%s2345_s1 + $0x20] sm:$0xf]  ;;  %v1369_v6 = vld [vmem:[%s2345_s1 + $0x24] sm:$0xf0] }
  0x17   : > { %v1306_v7 = vor.u32 %v1370_v2, %v1303_v4  ;;  %v1368_v8 = vld [vmem:[%s2345_s1 + $0x24] sm:$0xf]  ;;  %v1295_v9 = vld [vmem:[%s2345_s1 + $0x28] sm:$0xf0]  ;;  %v1294_v10 = vor.u32 %v1369_v6, %v1293_v5  ;;  %v1285_v12 = vld [vmem:[%s2345_s1 + $0x10] sm:$0xf] }
  0x18   : > { %437 = vmatpush.bf16.msra.mxu0 %v1302_v3  ;;  %1374 = vmatpush.bf16.msra.mxu2 %v1302_v3  ;;  %v1298_v11 = vor.u32 %v1368_v8, %v1295_v9  ;;  %v1367_v13 = vld [vmem:[%s2345_s1 + $0x14] sm:$0xf0]  ;;  %v1366_v14 = vld [vmem:[%s2345_s1 + $0x14] sm:$0xf]  ;;  %v1287_v15 = vld [vmem:[%s2345_s1 + $0x18] sm:$0xf0] }
  0x19   : > { %526 = vmatpush.bf16.msra.mxu1 %v1306_v7  ;;  %1378 = vmatpush.bf16.msra.mxu3 %v1306_v7  ;;  %s1207_s8 = sshll.u32 %s1572_s19, 5  ;;  %v1286_v16 = vor.u32 %v1367_v13, %v1285_v12  ;;  %v1290_v17 = vor.u32 %v1366_v14, %v1287_v15  ;;  %v1277_v18 = vld [vmem:[%s2345_s1] sm:$0xf]  ;;  %v1365_v19 = vld [vmem:[%s2345_s1 + $0x4] sm:$0xf0]  ;;  %vm384_vm0 = vcmask 523264  }
  0x1a   : > { %p211_p10 = scmp.lt.s32.totalorder %s1207_s8, 63  ;;  %v1364_v20 = vld [vmem:[%s2345_s1 + $0x4] sm:$0xf]  ;;  %v1279_v21 = vld [vmem:[%s2345_s1 + $0x8] sm:$0xf0]  ;;  %v1278_v22 = vor.u32 %v1365_v19, %v1277_v18  ;;  %s1705_s30 = sand.u32 1, %s1514_s16  }
  0x1b   : > { %v1282_v23 = vor.u32 %v1364_v20, %v1279_v21  ;;  %s1205_s5 = sshll.u32 %s1705_s30, 8  ;;  %vm648_vm1 = vcmask 261120  }
  0x1c   : > { %438 = vmatpush.bf16.msra.mxu0 %v1294_v10  ;;  %1375 = vmatpush.bf16.msra.mxu2 %v1294_v10  ;;  %s2409_s8 = smov (!%p211_p10, %s1207_s8), 63  ;;  %s1716_s11 = scalar_lea.vmem [#allocation2], %s1205_s5 }
  0x1d   : > { %527 = vmatpush.bf16.msra.mxu1 %v1298_v11  ;;  %1379 = vmatpush.bf16.msra.mxu3 %v1298_v11  ;;  %s1208_s23 = sshll.u32 %s2409_s8, 2  ;;  %s1210_s6 = sshll.u32 %s2409_s8, 3 }
  0x1e   : > { %s1654_s29 = scalar_lea.vmem %s2344_s0, %s1208_s23  ;;  %s1712_s10 = scalar_lea.vmem %s2347_s3, %s1210_s6 }
  0x1f   : > { %v1348_v24 = vld [vmem:[%s1654_s29] sm:$0xff]  ;;  %v1349_v26 = vld [vmem:[%s1654_s29 + $0x8] sm:$0xff]  ;;  %v1350_v28 = vld [vmem:[%s1654_s29 + $0x10] sm:$0xff]  ;;  %s1372_s8 = sshll.u32 %s1572_s19, 8  ;;  %s1059_s20 = sshll.u32 %s1716_s11, 4  ;;  %s1060_s20 = int_to_ptr.vmem [resolvable:$true] %s1059_s20 }
  0x20   : > { %439 = vmatpush.bf16.msra.mxu0 %v1286_v16  ;;  %1376 = vmatpush.bf16.msra.mxu2 %v1286_v16  ;;  %v1356_v25 = vld [vmem:[%s1654_s29 + $0x40] sm:$0xff]  ;;  %v1357_v27 = vld [vmem:[%s1654_s29 + $0x48] sm:$0xff]  ;;  %v1358_v29 = vld [vmem:[%s1654_s29 + $0x50] sm:$0xff]  ;;  %s1058_s14 = scalar_lea.hbm %s2346_s2, %s1372_s8  ;;  %s1037_s23 = scalar_lea.sflag [#allocation3], %s1705_s30 }
  0x21   : > { %528 = vmatpush.bf16.msra.mxu1 %v1290_v17  ;;  %1380 = vmatpush.bf16.msra.mxu3 %v1290_v17  ;;  %v1351_v30 = vld [vmem:[%s1654_s29 + $0x18] sm:$0xff]  ;;  %v1352_v32 = vld [vmem:[%s1654_s29 + $0x20] sm:$0xff]  ;;  %v1353_v34 = vld [vmem:[%s1654_s29 + $0x28] sm:$0xff]  ;;  %s1061_s22 = sshll.u32 %s1058_s14, 4  ;;  %s1448_s6 = scalar_lea.hbm %s2346_s2, 512  ;;  %s1062_s22 = int_to_ptr.hbm [resolvable:$true] %s1061_s22 }
  0x22   : > { %v1359_v31 = vld [vmem:[%s1654_s29 + $0x58] sm:$0xff]  ;;  %v1360_v33 = vld [vmem:[%s1654_s29 + $0x60] sm:$0xff]  ;;  %v1361_v35 = vld [vmem:[%s1654_s29 + $0x68] sm:$0xff]  ;;  %s1442_s27 = sshra.s32 %s1062_s22, 4  ;;  %s1443_s27 = int_to_ptr.hbm [resolvable:$true] %s1442_s27 }
  0x23   : > { %v1354_v36 = vld [vmem:[%s1654_s29 + $0x30] sm:$0xff]  ;;  %v1355_v38 = vld [vmem:[%s1654_s29 + $0x38] sm:$0xff]  ;;  %s1444_s28 = scalar_lea.hbm %s1443_s27, 256  ;;  %p1449_p0 = scmp.lt.s32.totalorder %s1443_s27, %s2346_s2 }
  0x24   : > { %440 = vmatpush.bf16.msra.mxu0 %v1278_v22  ;;  %1377 = vmatpush.bf16.msra.mxu2 %v1278_v22  ;;  %v1362_v37 = vld [vmem:[%s1654_s29 + $0x70] sm:$0xff]  ;;  %v1363_v39 = vld [vmem:[%s1654_s29 + $0x78] sm:$0xff]  ;;  %p1445_p11 = scmp.ne.s32.totalorder %s1443_s27, %s1444_s28  ;;  %p1450_p1 = scmp.lt.s32.totalorder %s1448_s6, %s1444_s28 }
  0x25   : > { %529 = vmatpush.bf16.msra.mxu1 %v1282_v23  ;;  %1381 = vmatpush.bf16.msra.mxu3 %v1282_v23 }
  0x26   : > { %p1446_p12 = pnand %p1445_p11, %p1589_p5  ;;  %p1451_p2 = por %p1450_p1, %p1449_p0 }
  0x27   : > { %1307 = vmatmul.msk.bf16.vlgmr.msra.gmra.mxu0 %vm384_vm0, %v1348_v24  ;;  %1315 = vmatmul.msk.bf16.vlgmr.msra.gmra.mxu2 %vm384_vm0, %v1356_v25 }
  0x28   : > { %1323 = vmatmul.msk.bf16.vlgmr.msra.gmra.mxu1 %vm384_vm0, %v1348_v24  ;;  %1331 = vmatmul.msk.bf16.vlgmr.msra.gmra.mxu3 %vm384_vm0, %v1356_v25  ;;  %p1447_p13 = pneg %p1446_p12 }
  0x2a   : > { %p1452_p3 = pnand %p1451_p2, %p1447_p13 }
  0x37   : > { %1308 = vmatmul.msk.bf16.gmra.mxu0 %vm384_vm0, %v1349_v26  ;;  %1316 = vmatmul.msk.bf16.gmra.mxu2 %vm384_vm0, %v1357_v27 }
  0x38   : > { %1324 = vmatmul.msk.bf16.gmra.mxu1 %vm384_vm0, %v1349_v26  ;;  %1332 = vmatmul.msk.bf16.gmra.mxu3 %vm384_vm0, %v1357_v27 }
  0x47   : > { %1309 = vmatmul.msk.bf16.gmra.mxu0 %vm384_vm0, %v1350_v28  ;;  %1317 = vmatmul.msk.bf16.gmra.mxu2 %vm384_vm0, %v1358_v29 }
  0x48   : > { %1325 = vmatmul.msk.bf16.gmra.mxu1 %vm384_vm0, %v1350_v28  ;;  %1333 = vmatmul.msk.bf16.gmra.mxu3 %vm384_vm0, %v1358_v29 }
  0x57   : > { %1310 = vmatmul.msk.bf16.gmra.mxu0 %vm384_vm0, %v1351_v30  ;;  %1318 = vmatmul.msk.bf16.gmra.mxu2 %vm384_vm0, %v1359_v31 }
  0x58   : > { %1326 = vmatmul.msk.bf16.gmra.mxu1 %vm384_vm0, %v1351_v30  ;;  %1334 = vmatmul.msk.bf16.gmra.mxu3 %vm384_vm0, %v1359_v31 }
  0x67   : > { %1311 = vmatmul.msk.bf16.gmra.mxu0 %vm384_vm0, %v1352_v32  ;;  %1319 = vmatmul.msk.bf16.gmra.mxu2 %vm384_vm0, %v1360_v33 }
  0x68   : > { %1327 = vmatmul.msk.bf16.gmra.mxu1 %vm384_vm0, %v1352_v32  ;;  %1335 = vmatmul.msk.bf16.gmra.mxu3 %vm384_vm0, %v1360_v33 }
  0x77   : > { %1312 = vmatmul.msk.bf16.gmra.mxu0 %vm384_vm0, %v1353_v34  ;;  %1320 = vmatmul.msk.bf16.gmra.mxu2 %vm384_vm0, %v1361_v35 }
  0x78   : > { %1328 = vmatmul.msk.bf16.gmra.mxu1 %vm384_vm0, %v1353_v34  ;;  %1336 = vmatmul.msk.bf16.gmra.mxu3 %vm384_vm0, %v1361_v35 }
  0x87   : > { %1313 = vmatmul.msk.bf16.gmra.mxu0 %vm384_vm0, %v1354_v36  ;;  %1321 = vmatmul.msk.bf16.gmra.mxu2 %vm384_vm0, %v1362_v37 }
  0x88   : > { %1329 = vmatmul.msk.bf16.gmra.mxu1 %vm384_vm0, %v1354_v36  ;;  %1337 = vmatmul.msk.bf16.gmra.mxu3 %vm384_vm0, %v1362_v37 }
  0x97   : > { %1314 = vmatmul.msk.bf16.gmra.mxu0 %vm384_vm0, %v1355_v38  ;;  %1322 = vmatmul.msk.bf16.gmra.mxu2 %vm384_vm0, %v1363_v39 }
  0x98   : > { %1330 = vmatmul.msk.bf16.gmra.mxu1 %vm384_vm0, %v1355_v38  ;;  %1338 = vmatmul.msk.bf16.gmra.mxu3 %vm384_vm0, %v1363_v39 }
  0xa4   : > { %v1714_v40 = vpop.f32.mrf.mxu0 }
  0xa5   : > { %972 = vst [vmem:[%s1716_s11] sm:$0xff] %v1714_v40  ;;  %v1720_v41 = vpop.f32.mrf.mxu1 }
  0xa6   : > { %1004 = vst.msk [vmem:[%s1712_s10] sm:$0xff] %vm648_vm1, %v1720_v41  ;;  %v649_v24 = vsel %vm648_vm1, %v1720_v41, 0.0 }
  0xaa   : > { %v1725_v42 = vpop.f32.mrf.mxu2 }
  0xab   : > { %v1727_v43 = vpop.f32.mrf.mxu3  ;;  %988 = vst [vmem:[%s1716_s11 + $0x80] sm:$0xff] %v1725_v42 }
  0xac   : > { %v1731_v44 = vpop.f32.mrf.mxu0  ;;  %1020 = vst.msk [vmem:[%s1712_s10 + $0x80] sm:$0xff] %vm648_vm1, %v1727_v43 }
  0xad   : > { %973 = vst [vmem:[%s1716_s11 + $0x8] sm:$0xff] %v1731_v44  ;;  %v1738_v45 = vpop.f32.mrf.mxu1  ;;  %v611_v23 = vadd.f32 %v1731_v44, %v1714_v40 }
  0xae   : > { %1005 = vst.msk [vmem:[%s1712_s10 + $0x8] sm:$0xff] %vm648_vm1, %v1738_v45  ;;  %v650_v22 = vsel %vm648_vm1, %v1738_v45, 0.0 }
  0xaf   : > { %v651_v27 = vadd.f32 %v650_v22, %v649_v24 }
  0xb2   : > { %v1743_v46 = vpop.f32.mrf.mxu2 }
  0xb3   : > { %v1745_v47 = vpop.f32.mrf.mxu3  ;;  %989 = vst [vmem:[%s1716_s11 + $0x88] sm:$0xff] %v1743_v46 }
  0xb4   : > { %v1749_v48 = vpop.f32.mrf.mxu0  ;;  %1021 = vst.msk [vmem:[%s1712_s10 + $0x88] sm:$0xff] %vm648_vm1, %v1745_v47 }
  0xb5   : > { %974 = vst [vmem:[%s1716_s11 + $0x10] sm:$0xff] %v1749_v48  ;;  %v1756_v49 = vpop.f32.mrf.mxu1  ;;  %v612_v28 = vadd.f32 %v611_v23, %v1749_v48 }
  0xb6   : > { %1006 = vst.msk [vmem:[%s1712_s10 + $0x10] sm:$0xff] %vm648_vm1, %v1756_v49  ;;  %v652_v25 = vsel %vm648_vm1, %v1756_v49, 0.0 }
  0xb7   : > { %v653_v32 = vadd.f32 %v652_v25, %v651_v27 }
  0xba   : > { %v1761_v50 = vpop.f32.mrf.mxu2 }
  0xbb   : > { %2368 = vst [vmem:[#allocation8_spill] sm:$0xff] %v1761_v50  ;;  %v1763_v51 = vpop.f32.mrf.mxu3 }
  0xbc   : > { %990 = vst [vmem:[%s1716_s11 + $0x90] sm:$0xff] %v1761_v50  ;;  %v1767_v52 = vpop.f32.mrf.mxu0 }
  0xbd   : > { %1022 = vst.msk [vmem:[%s1712_s10 + $0x90] sm:$0xff] %vm648_vm1, %v1763_v51  ;;  %v1774_v53 = vpop.f32.mrf.mxu1  ;;  %v613_v33 = vadd.f32 %v612_v28, %v1767_v52 }
  0xbe   : > { %975 = vst [vmem:[%s1716_s11 + $0x18] sm:$0xff] %v1767_v52  ;;  %v654_v30 = vsel %vm648_vm1, %v1774_v53, 0.0 }
  0xbf   : > { %1007 = vst.msk [vmem:[%s1712_s10 + $0x18] sm:$0xff] %vm648_vm1, %v1774_v53  ;;  %v655_v36 = vadd.f32 %v654_v30, %v653_v32 }
  0xc2   : > { %v1779_v54 = vpop.f32.mrf.mxu2 }
  0xc3   : > { %2369 = vst [vmem:[#allocation9_spill] sm:$0xff] %v1779_v54  ;;  %v1781_v55 = vpop.f32.mrf.mxu3 }
  0xc4   : > { %991 = vst [vmem:[%s1716_s11 + $0x98] sm:$0xff] %v1779_v54  ;;  %v1785_v56 = vpop.f32.mrf.mxu0 }
  0xc5   : > { %2370 = vst [vmem:[#allocation10_spill] sm:$0xff] %v1785_v56  ;;  %v1792_v57 = vpop.f32.mrf.mxu1  ;;  %v614_v37 = vadd.f32 %v613_v33, %v1785_v56 }
  0xc6   : > { %1023 = vst.msk [vmem:[%s1712_s10 + $0x98] sm:$0xff] %vm648_vm1, %v1781_v55  ;;  %v656_v35 = vsel %vm648_vm1, %v1792_v57, 0.0 }
  0xc7   : > { %976 = vst [vmem:[%s1716_s11 + $0x20] sm:$0xff] %v1785_v56  ;;  %v657_v39 = vadd.f32 %v656_v35, %v655_v36 }
  0xc8   : > { %1008 = vst.msk [vmem:[%s1712_s10 + $0x20] sm:$0xff] %vm648_vm1, %v1792_v57 }
  0xca   : > { %v1797_v58 = vpop.f32.mrf.mxu2 }
  0xcb   : > { %v1799_v59 = vpop.f32.mrf.mxu3  ;;  %992 = vst [vmem:[%s1716_s11 + $0xa0] sm:$0xff] %v1797_v58 }
  0xcc   : > { %v1803_v60 = vpop.f32.mrf.mxu0  ;;  %1024 = vst.msk [vmem:[%s1712_s10 + $0xa0] sm:$0xff] %vm648_vm1, %v1799_v59 }
  0xcd   : > { %2371 = vst [vmem:[#allocation11_spill] sm:$0xff] %v1803_v60  ;;  %v1810_v61 = vpop.f32.mrf.mxu1  ;;  %v615_v22 = vadd.f32 %v614_v37, %v1803_v60 }
  0xce   : > { %977 = vst [vmem:[%s1716_s11 + $0x28] sm:$0xff] %v1803_v60  ;;  %v658_v38 = vsel %vm648_vm1, %v1810_v61, 0.0 }
  0xcf   : > { %1009 = vst.msk [vmem:[%s1712_s10 + $0x28] sm:$0xff] %vm648_vm1, %v1810_v61  ;;  %v659_v25 = vadd.f32 %v658_v38, %v657_v39 }
  0xd2   : > { %v1815_v62 = vpop.f32.mrf.mxu2 }
  0xd3   : > { %v1817_v63 = vpop.f32.mrf.mxu3  ;;  %993 = vst [vmem:[%s1716_s11 + $0xa8] sm:$0xff] %v1815_v62 }
  0xd4   : > { %v1821_v0 = vpop.f32.mrf.mxu0  ;;  %1025 = vst.msk [vmem:[%s1712_s10 + $0xa8] sm:$0xff] %vm648_vm1, %v1817_v63 }
  0xd5   : > { %2372 = vst [vmem:[#allocation12_spill] sm:$0xff] %v1821_v0  ;;  %v1828_v1 = vpop.f32.mrf.mxu1  ;;  %v616_v27 = vadd.f32 %v615_v22, %v1821_v0 }
  0xd6   : > { %978 = vst [vmem:[%s1716_s11 + $0x30] sm:$0xff] %v1821_v0  ;;  %v660_v23 = vsel %vm648_vm1, %v1828_v1, 0.0 }
  0xd7   : > { %1010 = vst.msk [vmem:[%s1712_s10 + $0x30] sm:$0xff] %vm648_vm1, %v1828_v1  ;;  %v661_v33 = vadd.f32 %v660_v23, %v659_v25 }
  0xda   : > { %v1833_v2 = vpop.f32.mrf.mxu2 }
  0xdb   : > { %v1835_v3 = vpop.f32.mrf.mxu3  ;;  %994 = vst [vmem:[%s1716_s11 + $0xb0] sm:$0xff] %v1833_v2 }
  0xdc   : > { %v1839_v4 = vpop.f32.mrf.mxu0  ;;  %1026 = vst.msk [vmem:[%s1712_s10 + $0xb0] sm:$0xff] %vm648_vm1, %v1835_v3 }
  0xdd   : > { %2373 = vst [vmem:[#allocation13_spill] sm:$0xff] %v1839_v4  ;;  %v1846_v5 = vpop.f32.mrf.mxu1  ;;  %v617_v35 = vadd.f32 %v616_v27, %v1839_v4 }
  0xde   : > { %979 = vst [vmem:[%s1716_s11 + $0x38] sm:$0xff] %v1839_v4  ;;  %v662_v30 = vsel %vm648_vm1, %v1846_v5, 0.0 }
  0xdf   : > { %1011 = vst.msk [vmem:[%s1712_s10 + $0x38] sm:$0xff] %vm648_vm1, %v1846_v5  ;;  %v663_v38 = vadd.f32 %v662_v30, %v661_v33 }
  0xe2   : > { %v1851_v6 = vpop.f32.mrf.mxu2 }
  0xe3   : > { %v1853_v7 = vpop.f32.mrf.mxu3  ;;  %995 = vst [vmem:[%s1716_s11 + $0xb8] sm:$0xff] %v1851_v6 }
  0xe4   : > { %v1857_v8 = vpop.f32.mrf.mxu0  ;;  %1027 = vst.msk [vmem:[%s1712_s10 + $0xb8] sm:$0xff] %vm648_vm1, %v1853_v7 }
  0xe5   : > { %2374 = vst [vmem:[#allocation14_spill] sm:$0xff] %v1857_v8  ;;  %v1864_v9 = vpop.f32.mrf.mxu1  ;;  %v618_v39 = vadd.f32 %v617_v35, %v1857_v8 }
  0xe6   : > { %980 = vst [vmem:[%s1716_s11 + $0x40] sm:$0xff] %v1857_v8  ;;  %v664_v37 = vsel %vm648_vm1, %v1864_v9, 0.0 }
  0xe7   : > { %1012 = vst.msk [vmem:[%s1712_s10 + $0x40] sm:$0xff] %vm648_vm1, %v1864_v9  ;;  %v665_v23 = vadd.f32 %v664_v37, %v663_v38 }
  0xea   : > { %v1869_v10 = vpop.f32.mrf.mxu2 }
  0xeb   : > { %v1871_v11 = vpop.f32.mrf.mxu3  ;;  %996 = vst [vmem:[%s1716_s11 + $0xc0] sm:$0xff] %v1869_v10 }
  0xec   : > { %v1875_v12 = vpop.f32.mrf.mxu0  ;;  %1028 = vst.msk [vmem:[%s1712_s10 + $0xc0] sm:$0xff] %vm648_vm1, %v1871_v11 }
  0xed   : > { %2375 = vst [vmem:[#allocation15_spill] sm:$0xff] %v1875_v12  ;;  %v1882_v13 = vpop.f32.mrf.mxu1  ;;  %v619_v25 = vadd.f32 %v618_v39, %v1875_v12 }
  0xee   : > { %981 = vst [vmem:[%s1716_s11 + $0x48] sm:$0xff] %v1875_v12  ;;  %v666_v22 = vsel %vm648_vm1, %v1882_v13, 0.0 }
  0xef   : > { %1013 = vst.msk [vmem:[%s1712_s10 + $0x48] sm:$0xff] %vm648_vm1, %v1882_v13  ;;  %v667_v0 = vadd.f32 %v666_v22, %v665_v23 }
  0xf2   : > { %v1887_v14 = vpop.f32.mrf.mxu2 }
  0xf3   : > { %v1889_v15 = vpop.f32.mrf.mxu3  ;;  %997 = vst [vmem:[%s1716_s11 + $0xc8] sm:$0xff] %v1887_v14 }
  0xf4   : > { %v1893_v16 = vpop.f32.mrf.mxu0  ;;  %1029 = vst.msk [vmem:[%s1712_s10 + $0xc8] sm:$0xff] %vm648_vm1, %v1889_v15 }
  0xf5   : > { %2376 = vst [vmem:[#allocation16_spill] sm:$0xff] %v1893_v16  ;;  %v1900_v17 = vpop.f32.mrf.mxu1  ;;  %v620_v60 = vadd.f32 %v619_v25, %v1893_v16 }
  0xf6   : > { %982 = vst [vmem:[%s1716_s11 + $0x50] sm:$0xff] %v1893_v16  ;;  %v668_v27 = vsel %vm648_vm1, %v1900_v17, 0.0 }
  0xf7   : > { %1014 = vst.msk [vmem:[%s1712_s10 + $0x50] sm:$0xff] %vm648_vm1, %v1900_v17  ;;  %v669_v35 = vadd.f32 %v668_v27, %v667_v0 }
  0xfa   : > { %v1905_v18 = vpop.f32.mrf.mxu2 }
  0xfb   : > { %v1907_v19 = vpop.f32.mrf.mxu3  ;;  %998 = vst [vmem:[%s1716_s11 + $0xd0] sm:$0xff] %v1905_v18 }
  0xfc   : > { %v1911_v20 = vpop.f32.mrf.mxu0  ;;  %1030 = vst.msk [vmem:[%s1712_s10 + $0xd0] sm:$0xff] %vm648_vm1, %v1907_v19 }
  0xfd   : > { %2377 = vst [vmem:[#allocation17_spill] sm:$0xff] %v1911_v20  ;;  %v1918_v21 = vpop.f32.mrf.mxu1  ;;  %v621_v37 = vadd.f32 %v620_v60, %v1911_v20 }
  0xfe   : > { %983 = vst [vmem:[%s1716_s11 + $0x58] sm:$0xff] %v1911_v20  ;;  %v670_v30 = vsel %vm648_vm1, %v1918_v21, 0.0 }
  0xff   : > { %1015 = vst.msk [vmem:[%s1712_s10 + $0x58] sm:$0xff] %vm648_vm1, %v1918_v21  ;;  %v671_v22 = vadd.f32 %v670_v30, %v669_v35 }
 0x102   : > { %v1931_v26 = vpop.f32.mrf.mxu2 }
 0x103   : > { %v1934_v29 = vpop.f32.mrf.mxu3  ;;  %999 = vst [vmem:[%s1716_s11 + $0xd8] sm:$0xff] %v1931_v26 }
 0x104   : > { %v1940_v31 = vpop.f32.mrf.mxu0  ;;  %1031 = vst.msk [vmem:[%s1712_s10 + $0xd8] sm:$0xff] %vm648_vm1, %v1934_v29 }
 0x105   : > { %984 = vst [vmem:[%s1716_s11 + $0x60] sm:$0xff] %v1940_v31  ;;  %v1948_v34 = vpop.f32.mrf.mxu1  ;;  %v622_v23 = vadd.f32 %v621_v37, %v1940_v31 }
 0x106   : > { %1016 = vst.msk [vmem:[%s1712_s10 + $0x60] sm:$0xff] %vm648_vm1, %v1948_v34  ;;  %v672_v39 = vsel %vm648_vm1, %v1948_v34, 0.0 }
 0x107   : > { %v673_v60 = vadd.f32 %v672_v39, %v671_v22 }
 0x10a   : > { %v1961_v24 = vpop.f32.mrf.mxu2 }
 0x10b   : > { %2378 = vst [vmem:[#allocation18_spill] sm:$0xff] %v1961_v24  ;;  %v1964_v28 = vpop.f32.mrf.mxu3 }
 0x10c   : > { %1000 = vst [vmem:[%s1716_s11 + $0xe0] sm:$0xff] %v1961_v24  ;;  %v1970_v32 = vpop.f32.mrf.mxu0 }
 0x10d   : > { %2379 = vst [vmem:[#allocation19_spill] sm:$0xff] %v1970_v32  ;;  %v1978_v36 = vpop.f32.mrf.mxu1  ;;  %v623_v25 = vadd.f32 %v622_v23, %v1970_v32 }
 0x10e   : > { %1032 = vst.msk [vmem:[%s1712_s10 + $0xe0] sm:$0xff] %vm648_vm1, %v1964_v28  ;;  %v674_v0 = vsel %vm648_vm1, %v1978_v36, 0.0 }
 0x10f   : > { %985 = vst [vmem:[%s1716_s11 + $0x68] sm:$0xff] %v1970_v32  ;;  %v675_v16 = vadd.f32 %v674_v0, %v673_v60  ;;  %v680_v60 = vsel %vm648_vm1, %v1727_v43, 0.0  ;;  %v684_v32 = vsel %vm648_vm1, %v1763_v51, 0.0 }
 0x110   : > { %1017 = vst.msk [vmem:[%s1712_s10 + $0x68] sm:$0xff] %vm648_vm1, %v1978_v36 }
 0x112   : > { %v1991_v4 = vpop.f32.mrf.mxu2 }
 0x113   : > { %2380 = vst [vmem:[#allocation20_spill] sm:$0xff] %v1991_v4  ;;  %v1994_v56 = vpop.f32.mrf.mxu3 }
 0x114   : > { %1001 = vst [vmem:[%s1716_s11 + $0xe8] sm:$0xff] %v1991_v4  ;;  %v2000_v33 = vpop.f32.mrf.mxu0 }
 0x115   : > { %2381 = vst [vmem:[#allocation21_spill] sm:$0xff] %v2000_v33  ;;  %v2008_v38 = vpop.f32.mrf.mxu1  ;;  %v624_v12 = vadd.f32 %v623_v25, %v2000_v33 }
 0x116   : > { %1033 = vst.msk [vmem:[%s1712_s10 + $0xe8] sm:$0xff] %vm648_vm1, %v1994_v56  ;;  %v676_v27 = vsel %vm648_vm1, %v2008_v38, 0.0 }
 0x117   : > { %986 = vst [vmem:[%s1716_s11 + $0x70] sm:$0xff] %v2000_v33  ;;  %v677_v35 = vadd.f32 %v676_v27, %v675_v16 }
 0x118   : > { %1018 = vst.msk [vmem:[%s1712_s10 + $0x70] sm:$0xff] %vm648_vm1, %v2008_v38 }
 0x11a   : > { %v2021_v20 = vpop.f32.mrf.mxu2 }
 0x11b   : > { %2382 = vst [vmem:[#allocation22_spill] sm:$0xff] %v2021_v20  ;;  %v2024_v8 = vpop.f32.mrf.mxu3 }
 0x11c   : > { %1002 = vst [vmem:[%s1716_s11 + $0xf0] sm:$0xff] %v2021_v20  ;;  %v2028_v30 = vpop.f32.mrf.mxu0 }
 0x11d   : > { %2383 = vst [vmem:[#allocation23_spill] sm:$0xff] %v2028_v30  ;;  %v625_v37 = vadd.f32 %v624_v12, %v2028_v30  ;;  %v2036_v39 = vpop.f32.mrf.mxu1  ;;  %v682_v12 = vsel %vm648_vm1, %v1745_v47, 0.0 }
 0x11e   : > { %1034 = vst.msk [vmem:[%s1712_s10 + $0xf0] sm:$0xff] %vm648_vm1, %v2024_v8  ;;  %v678_v22 = vsel %vm648_vm1, %v2036_v39, 0.0 }
 0x11f   : > { %987 = vst [vmem:[%s1716_s11 + $0x78] sm:$0xff] %v2028_v30  ;;  %v626_v23 = vadd.f32 %v625_v37, %v1725_v42  ;;  %v679_v0 = vadd.f32 %v678_v22, %v677_v35  ;;  %v686_v22 = vsel %vm648_vm1, %v1781_v55, 0.0 }
 0x120   : > { %1019 = vst.msk [vmem:[%s1712_s10 + $0x78] sm:$0xff] %vm648_vm1, %v2036_v39 }
 0x121   : > { %v627_v16 = vadd.f32 %v626_v23, %v1743_v46  ;;  %v681_v25 = vadd.f32 %v680_v60, %v679_v0  ;;  %v688_v60 = vsel %vm648_vm1, %v1799_v59, 0.0 }
 0x123   : > { %v628_v27 = vadd.f32 %v627_v16, %v1761_v50  ;;  %v683_v30 = vadd.f32 %v682_v12, %v681_v25  ;;  %v2050_v33 = vpop.f32.mrf.mxu3  ;;  %v690_v12 = vsel %vm648_vm1, %v1817_v63, 0.0 }
 0x124   : > { %1035 = vst.msk [vmem:[%s1712_s10 + $0xf8] sm:$0xff] %vm648_vm1, %v2050_v33 }
 0x125   : > { %v629_v35 = vadd.f32 %v628_v27, %v1779_v54  ;;  %v685_v37 = vadd.f32 %v684_v32, %v683_v30  ;;  %v692_v27 = vsel %vm648_vm1, %v1835_v3, 0.0  ;;  %v2069_v54 = vpop.f32.mrf.mxu2 }
 0x126   : > { %2384 = vst [vmem:[#allocation24_spill] sm:$0xff] %v2069_v54 }
 0x127   : > { %v630_v23 = vadd.f32 %v629_v35, %v1797_v58  ;;  %v687_v0 = vadd.f32 %v686_v22, %v685_v37  ;;  %v694_v35 = vsel %vm648_vm1, %v1853_v7, 0.0  ;;  %1003 = vst [vmem:[%s1716_s11 + $0xf8] sm:$0xff] %v2069_v54  ;;  %v696_v22 = vsel %vm648_vm1, %v1871_v11, 0.0 }
 0x129   : > { %v631_v16 = vadd.f32 %v630_v23, %v1815_v62  ;;  %v689_v25 = vadd.f32 %v688_v60, %v687_v0  ;;  %v698_v60 = vsel %vm648_vm1, %v1889_v15, 0.0 }
 0x12b   : > { %v691_v50 = vadd.f32 %v690_v12, %v689_v25  ;;  %v632_v32 = vadd.f32 %v631_v16, %v1833_v2 }
 0x12d   : > { %v693_v30 = vadd.f32 %v692_v27, %v691_v50  ;;  %v633_v23 = vadd.f32 %v632_v32, %v1851_v6  ;;  %v700_v50 = vsel %vm648_vm1, %v1907_v19, 0.0  ;;  %v702_v27 = vsel %vm648_vm1, %v1934_v29, 0.0 }
 0x12e   : > { %v704_v32 = vsel %vm648_vm1, %v1964_v28, 0.0 }
 0x12f   : > { %v695_v37 = vadd.f32 %v694_v35, %v693_v30  ;;  %v634_v16 = vadd.f32 %v633_v23, %v1869_v10  ;;  %v708_v23 = vsel %vm648_vm1, %v2024_v8, 0.0 }
 0x131   : > { %v697_v0 = vadd.f32 %v696_v22, %v695_v37  ;;  %v635_v35 = vadd.f32 %v634_v16, %v1887_v14  ;;  %v706_v22 = vsel %vm648_vm1, %v1994_v56, 0.0 }
 0x133   : > { %v699_v25 = vadd.f32 %v698_v60, %v697_v0  ;;  %v636_v60 = vadd.f32 %v635_v35, %v1905_v18 }
 0x135   : > { %v701_v12 = vadd.f32 %v700_v50, %v699_v25  ;;  %v710_v50 = vsel %vm648_vm1, %v2050_v33, 0.0 }
 0x137   : > { %v703_v30 = vadd.f32 %v702_v27, %v701_v12  ;;  %v637_v27 = vadd.f32 %v636_v60, %v1931_v26 }
 0x139   : > { %v705_v37 = vadd.f32 %v704_v32, %v703_v30  ;;  %v638_v32 = vadd.f32 %v637_v27, %v1961_v24 }
 0x13b   : > { %v707_v0 = vadd.f32 %v706_v22, %v705_v37 }
 0x13d   : > { %v709_v25 = vadd.f32 %v708_v23, %v707_v0 }
 0x13f   : > { %v711_v12 = vadd.f32 %v710_v50, %v709_v25 }
 0x141   : > { %v712_v16 = vrot.slane %v711_v12, 4 }
 0x143   : > { %v713_v30 = vadd.f32 %v712_v16, %v711_v12 }
 0x145   : > { %v714_v35 = vrot.slane %v713_v30, 2 }
 0x146   : > { %1455 = shalt.err (!%p1452_p3)
}
 0x147   : > { %s1524_s10 = smov 128   ;;  %s1525_s11 = smov 8   ;;  %v715_v37 = vadd.f32 %v714_v35, %v713_v30  ;;  %v639_v22 = vadd.f32 %v638_v32, %v1991_v4  ;;  %vm957_vm2 = vcmask 1040384  }
 0x148   : > { %1382 = dma.vmem_to_hbm [thread:$0]  (%p1589_p5), %s1060_s20, 4096, %s1062_s22, %s1037_s23, %s1524_s10, %s1524_s10, %s1525_s11  }
 0x149   : > { %v716_v0 = vrot.slane %v715_v37, 1  ;;  %v640_v23 = vadd.f32 %v639_v22, %v2021_v20  ;;  %s1206_s8 = sshll.u32 %s1705_s30, 2  ;;  %s1373_s13 = sshll.u32 %s1572_s19, 2 }
 0x14a   : > { %s2212_s12 = scalar_lea.vmem [#allocation4], %s1206_s8  ;;  %s1079_s22 = scalar_lea.hbm %s2348_s4, %s1373_s13 }
 0x14b   : > { %v2114_v60 = vadd.f32 %v716_v0, %v715_v37  ;;  %v641_v50 = vadd.f32 %v640_v23, %v2069_v54  ;;  %s1081_s23 = sshll.u32 %s2212_s12, 4  ;;  %s1083_s27 = sshll.u32 %s1079_s22, 4  ;;  %s1082_s23 = int_to_ptr.vmem [resolvable:$true] %s1081_s23  ;;  %s1084_s27 = int_to_ptr.hbm [resolvable:$true] %s1083_s27 }
 0x14c   : > { %s1047_s19 = scalar_lea.sflag [#allocation5], %s1705_s30  ;;  %s1470_s28 = sshra.s32 %s1084_s27, 4  ;;  %s1471_s28 = int_to_ptr.hbm [resolvable:$true] %s1470_s28 }
 0x14d   : > { %v2118_v25 = vmul.f32 0.00390625, %v2114_v60  ;;  %v642_v16 = vrot.slane %v641_v50, 4  ;;  %s1472_s29 = scalar_lea.hbm %s1471_s28, 4  ;;  %s1476_s7 = scalar_lea.hbm %s2348_s4, 8 }
 0x14e   : > { %p1473_p4 = scmp.ne.s32.totalorder %s1471_s28, %s1472_s29  ;;  %p1477_p9 = scmp.lt.s32.totalorder %s1471_s28, %s2348_s4 }
 0x14f   : > { %v2123_v12 = vsub.f32 %v2008_v38, %v2118_v25  ;;  %v2127_v27 = vsub.f32 %v2036_v39, %v2118_v25  ;;  %v2131_v30 = vsub.f32 %v2050_v33, %v2118_v25  ;;  %v721_v32 = vsub.f32 %v1720_v41, %v2118_v25  ;;  %p1478_p10 = scmp.lt.s32.totalorder %s1476_s7, %s1472_s29 }
 0x150   : > { %v723_v35 = vsub.f32 %v1738_v45, %v2118_v25  ;;  %v643_v37 = vadd.f32 %v642_v16, %v641_v50  ;;  %v725_v38 = vsub.f32 %v1756_v49, %v2118_v25  ;;  %v727_v22 = vsub.f32 %v1774_v53, %v2118_v25  ;;  %p1474_p7 = pnand %p1473_p4, %p1589_p5 }
 0x151   : > { %v785_v39 = vmul.f32 %v721_v32, %v721_v32  ;;  %v729_v33 = vsub.f32 %v1792_v57, %v2118_v25  ;;  %v731_v41 = vsub.f32 %v1810_v61, %v2118_v25  ;;  %v733_v53 = vsub.f32 %v1828_v1, %v2118_v25  ;;  %p1479_p11 = por %p1478_p10, %p1477_p9 }
 0x152   : > { %v787_v0 = vmul.f32 %v723_v35, %v723_v35  ;;  %v644_v23 = vrot.slane %v643_v37, 2  ;;  %v789_v54 = vmul.f32 %v725_v38, %v725_v38  ;;  %v791_v20 = vmul.f32 %v727_v22, %v727_v22  ;;  %p1475_p8 = pneg %p1474_p7 }
 0x153   : > { %v885_v45 = vsel %vm648_vm1, %v785_v39, 0.0  ;;  %v793_v32 = vmul.f32 %v729_v33, %v729_v33  ;;  %v735_v57 = vsub.f32 %v1846_v5, %v2118_v25  ;;  %v795_v38 = vmul.f32 %v731_v41, %v731_v41 }
 0x154   : > { %v886_v50 = vsel %vm648_vm1, %v787_v0, 0.0  ;;  %v645_v49 = vadd.f32 %v644_v23, %v643_v37  ;;  %v888_v35 = vsel %vm648_vm1, %v789_v54, 0.0  ;;  %v890_v61 = vsel %vm648_vm1, %v791_v20, 0.0  ;;  %p1480_p12 = pnand %p1479_p11, %p1475_p8 }
 0x155   : > { %v887_v16 = vadd.f32 %v886_v50, %v885_v45  ;;  %v737_v39 = vsub.f32 %v1864_v9, %v2118_v25  ;;  %v797_v0 = vmul.f32 %v733_v53, %v733_v53  ;;  %v892_v37 = vsel %vm648_vm1, %v793_v32, 0.0 }
 0x156   : > { %v646_v24 = vrot.slane %v645_v49, 1  ;;  %v739_v1 = vsub.f32 %v1882_v13, %v2118_v25  ;;  %v799_v54 = vmul.f32 %v735_v57, %v735_v57  ;;  %v894_v33 = vsel %vm648_vm1, %v795_v38, 0.0 }
 0x157   : > { %v889_v4 = vadd.f32 %v888_v35, %v887_v16  ;;  %v741_v20 = vsub.f32 %v1900_v17, %v2118_v25  ;;  %v896_v41 = vsel %vm648_vm1, %v797_v0, 0.0  ;;  %v743_v9 = vsub.f32 %v1918_v21, %v2118_v25 }
 0x158   : > { %v647_v5 = vadd.f32 %v646_v24, %v645_v49  ;;  %v803_v16 = vmul.f32 %v739_v1, %v739_v1  ;;  %v898_v53 = vsel %vm648_vm1, %v799_v54, 0.0  ;;  %v745_v35 = vsub.f32 %v1948_v34, %v2118_v25 }
 0x159   : > { %v891_v22 = vadd.f32 %v890_v61, %v889_v4  ;;  %v801_v4 = vmul.f32 %v737_v39, %v737_v39  ;;  %v805_v24 = vmul.f32 %v741_v20, %v741_v20  ;;  %v747_v57 = vsub.f32 %v1978_v36, %v2118_v25 }
 0x15a   : > { %v2165_v13 = vmul.f32 0.00390625, %v647_v5  ;;  %v807_v38 = vmul.f32 %v743_v9, %v743_v9  ;;  %v902_v61 = vsel %vm648_vm1, %v803_v16, 0.0  ;;  %v809_v0 = vmul.f32 %v745_v35, %v745_v35  ;;  %v2385_v9 = vld [vmem:[#allocation10_spill] sm:$0xff] }
 0x15b   : > { %v893_v23 = vadd.f32 %v892_v37, %v891_v22  ;;  %v900_v49 = vsel %vm648_vm1, %v801_v4, 0.0  ;;  %v904_v34 = vsel %vm648_vm1, %v805_v24, 0.0 }
 0x15c   : > { %v720_v22 = vsub.f32 %v1714_v40, %v2165_v13  ;;  %v722_v39 = vsub.f32 %v1731_v44, %v2165_v13  ;;  %v906_v1 = vsel %vm648_vm1, %v807_v38, 0.0  ;;  %v724_v36 = vsub.f32 %v1749_v48, %v2165_v13 }
 0x15d   : > { %v895_v45 = vadd.f32 %v894_v33, %v893_v23  ;;  %v811_v23 = vmul.f32 %v747_v57, %v747_v57  ;;  %v753_v40 = vsub.f32 %v1727_v43, %v2118_v25  ;;  %v813_v44 = vmul.f32 %v2123_v12, %v2123_v12 }
 0x15e   : > { %v784_v33 = vmul.f32 %v720_v22, %v720_v22  ;;  %v908_v20 = vsel %vm648_vm1, %v809_v0, 0.0  ;;  %v728_v16 = vsub.f32 %v2385_v9, %v2165_v13  ;;  %v755_v48 = vsub.f32 %v1745_v47, %v2118_v25  ;;  %v2391_v9 = vld [vmem:[#allocation14_spill] sm:$0xff] }
 0x15f   : > { %v897_v50 = vadd.f32 %v896_v41, %v895_v45  ;;  %v786_v45 = vmul.f32 %v722_v39, %v722_v39  ;;  %v956_v41 = vrot.slane %v2114_v60, 7  ;;  %v815_v43 = vmul.f32 %v2127_v27, %v2127_v27 }
 0x160   : > { %v910_v12 = vsel %vm648_vm1, %v811_v23, 0.0  ;;  %v757_v60 = vsub.f32 %v1763_v51, %v2118_v25  ;;  %v960_v57 = vlaneseq  ;;  %v819_v22 = vmul.f32 %v755_v48, %v755_v48 }
 0x161   : > { %v899_v32 = vadd.f32 %v898_v53, %v897_v50  ;;  %v726_v50 = vsub.f32 %v1767_v52, %v2165_v13  ;;  %v2386_v53 = vld [vmem:[#allocation11_spill] sm:$0xff]  ;;  %v788_v52 = vmul.f32 %v724_v36, %v724_v36  ;;  %v848_v24 = vadd.f32 %v786_v45, %v784_v33  ;;  %v2390_v33 = vld [vmem:[#allocation13_spill] sm:$0xff] }
 0x162   : > { %v958_v27 = vsel %vm957_vm2, %v647_v5, %v956_v41  ;;  %v914_v39 = vsel %vm648_vm1, %v815_v43, 0.0  ;;  %vm2206_vm3 = vcmp.lt.s32.totalorder %v960_v57, 160  ;;  %v792_v23 = vmul.f32 %v728_v16, %v728_v16 }
 0x163   : > { %v901_v17 = vadd.f32 %v900_v49, %v899_v32  ;;  %v730_v32 = vsub.f32 %v2386_v53, %v2165_v13  ;;  %v817_v49 = vmul.f32 %v753_v40, %v753_v40  ;;  %v790_v38 = vmul.f32 %v726_v50, %v726_v50  ;;  %964 = vst.msk [vmem:[%s2212_s12] ss:$2 sm:$0x3] %vm2206_vm3, %v958_v27 }
 0x164   : > { %v821_v5 = vmul.f32 %v757_v60, %v757_v60  ;;  %v734_v45 = vsub.f32 %v2390_v33, %v2165_v13  ;;  %v918_v41 = vsel %vm648_vm1, %v819_v22, 0.0  ;;  %v736_v16 = vsub.f32 %v2391_v9, %v2165_v13  ;;  %v2392_v60 = vld [vmem:[#allocation15_spill] sm:$0xff] }
 0x165   : > { %v903_v21 = vadd.f32 %v902_v61, %v901_v17  ;;  %v912_v17 = vsel %vm648_vm1, %v813_v44, 0.0  ;;  %v849_v61 = vadd.f32 %v848_v24, %v788_v52  ;;  %v794_v40 = vmul.f32 %v730_v32, %v730_v32 }
 0x166   : > { %v765_v43 = vsub.f32 %v1835_v3, %v2118_v25  ;;  %v920_v53 = vsel %vm648_vm1, %v821_v5, 0.0  ;;  %v767_v24 = vsub.f32 %v1853_v7, %v2118_v25  ;;  %v800_v3 = vmul.f32 %v736_v16, %v736_v16 }
 0x167   : > { %v905_v37 = vadd.f32 %v904_v34, %v903_v21  ;;  %v759_v21 = vsub.f32 %v1781_v55, %v2118_v25  ;;  %v2389_v34 = vld [vmem:[#allocation12_spill] sm:$0xff]  ;;  %v761_v55 = vsub.f32 %v1799_v59, %v2118_v25  ;;  %v769_v27 = vsub.f32 %v1871_v11, %v2118_v25 }
 0x168   : > { %v773_v33 = vsub.f32 %v1907_v19, %v2118_v25 }
 0x169   : > { %v907_v54 = vadd.f32 %v906_v1, %v905_v37  ;;  %v732_v37 = vsub.f32 %v2389_v34, %v2165_v13  ;;  %v850_v1 = vadd.f32 %v849_v61, %v790_v38 }
 0x16b   : > { %v909_v4 = vadd.f32 %v908_v20, %v907_v54  ;;  %v916_v54 = vsel %vm648_vm1, %v817_v49, 0.0  ;;  %v851_v44 = vadd.f32 %v850_v1, %v792_v23  ;;  %v763_v20 = vsub.f32 %v1817_v63, %v2118_v25 }
 0x16c   : > { %v796_v59 = vmul.f32 %v732_v37, %v732_v37  ;;  %v798_v63 = vmul.f32 %v734_v45, %v734_v45  ;;  %v771_v23 = vsub.f32 %v1889_v15, %v2118_v25  ;;  %v831_v1 = vmul.f32 %v767_v24, %v767_v24 }
 0x16d   : > { %v911_v35 = vadd.f32 %v910_v12, %v909_v4  ;;  %v823_v4 = vmul.f32 %v759_v21, %v759_v21  ;;  %v852_v48 = vadd.f32 %v851_v44, %v794_v40  ;;  %v825_v12 = vmul.f32 %v761_v55, %v761_v55 }
 0x16e   : > { %v827_v49 = vmul.f32 %v763_v20, %v763_v20  ;;  %v829_v21 = vmul.f32 %v765_v43, %v765_v43  ;;  %v833_v45 = vmul.f32 %v769_v27, %v769_v27  ;;  %v2395_v20 = vld [vmem:[#allocation19_spill] sm:$0xff]  ;;  %v835_v9 = vmul.f32 %v771_v23, %v771_v23 }
 0x16f   : > { %v913_v47 = vadd.f32 %v912_v17, %v911_v35  ;;  %v738_v35 = vsub.f32 %v2392_v60, %v2165_v13  ;;  %v853_v52 = vadd.f32 %v852_v48, %v796_v59  ;;  %v922_v17 = vsel %vm648_vm1, %v823_v4, 0.0  ;;  %v2396_v59 = vld [vmem:[#allocation21_spill] sm:$0xff] }
 0x170   : > { %v924_v22 = vsel %vm648_vm1, %v825_v12, 0.0  ;;  %v926_v55 = vsel %vm648_vm1, %v827_v49, 0.0  ;;  %v928_v40 = vsel %vm648_vm1, %v829_v21, 0.0  ;;  %v746_v4 = vsub.f32 %v2395_v20, %v2165_v13 }
 0x171   : > { %v915_v0 = vadd.f32 %v914_v39, %v913_v47  ;;  %v2393_v47 = vld [vmem:[#allocation16_spill] sm:$0xff]  ;;  %v854_v61 = vadd.f32 %v853_v52, %v798_v63  ;;  %v802_v7 = vmul.f32 %v738_v35, %v738_v35  ;;  %v748_v48 = vsub.f32 %v2396_v59, %v2165_v13  ;;  %v2397_v35 = vld [vmem:[#allocation23_spill] sm:$0xff] }
 0x172   : > { %v740_v38 = vsub.f32 %v2393_v47, %v2165_v13  ;;  %v777_v12 = vsub.f32 %v1964_v28, %v2118_v25  ;;  %v750_v63 = vsub.f32 %v2397_v35, %v2165_v13  ;;  %v779_v24 = vsub.f32 %v1994_v56, %v2118_v25 }
 0x173   : > { %v917_v36 = vadd.f32 %v916_v54, %v915_v0  ;;  %v2394_v0 = vld [vmem:[#allocation17_spill] sm:$0xff]  ;;  %v855_v37 = vadd.f32 %v854_v61, %v800_v3  ;;  %v744_v54 = vsub.f32 %v1940_v31, %v2165_v13  ;;  %v930_v31 = vsel %vm648_vm1, %v831_v1, 0.0 }
 0x174   : > { %v742_v34 = vsub.f32 %v2394_v0, %v2165_v13  ;;  %v804_v11 = vmul.f32 %v740_v38, %v740_v38  ;;  %v752_v47 = vsub.f32 %v1725_v42, %v2165_v13  ;;  %v812_v28 = vmul.f32 %v748_v48, %v748_v48  ;;  %v2398_v42 = vld [vmem:[#allocation8_spill] sm:$0xff] }
 0x175   : > { %v919_v50 = vadd.f32 %v918_v41, %v917_v36  ;;  %v856_v36 = vadd.f32 %v855_v37, %v802_v7  ;;  %v808_v19 = vmul.f32 %v744_v54, %v744_v54  ;;  %v781_v3 = vsub.f32 %v2024_v8, %v2118_v25 }
 0x176   : > { %v806_v15 = vmul.f32 %v742_v34, %v742_v34  ;;  %v841_v61 = vmul.f32 %v777_v12, %v777_v12  ;;  %v814_v56 = vmul.f32 %v750_v63, %v750_v63  ;;  %v843_v0 = vmul.f32 %v779_v24, %v779_v24 }
 0x177   : > { %v921_v32 = vadd.f32 %v920_v53, %v919_v50  ;;  %v857_v41 = vadd.f32 %v856_v36, %v804_v11  ;;  %v775_v50 = vsub.f32 %v1934_v29, %v2118_v25  ;;  %v837_v53 = vmul.f32 %v773_v33, %v773_v33 }
 0x178   : > { %v810_v29 = vmul.f32 %v746_v4, %v746_v4  ;;  %v756_v37 = vsub.f32 %v2398_v42, %v2165_v13  ;;  %v816_v23 = vmul.f32 %v752_v47, %v752_v47  ;;  %v940_v8 = vsel %vm648_vm1, %v841_v61, 0.0 }
 0x179   : > { %v923_v57 = vadd.f32 %v922_v17, %v921_v32  ;;  %v858_v43 = vadd.f32 %v857_v41, %v806_v15  ;;  %v932_v32 = vsel %vm648_vm1, %v833_v45, 0.0  ;;  %v839_v49 = vmul.f32 %v775_v50, %v775_v50 }
 0x17a   : > { %v934_v17 = vsel %vm648_vm1, %v835_v9, 0.0  ;;  %v936_v27 = vsel %vm648_vm1, %v837_v53, 0.0  ;;  %v847_v36 = vmul.f32 %v2131_v30, %v2131_v30  ;;  %v942_v33 = vsel %vm648_vm1, %v843_v0, 0.0 }
 0x17b   : > { %v925_v39 = vadd.f32 %v924_v22, %v923_v57  ;;  %v859_v52 = vadd.f32 %v858_v43, %v808_v19  ;;  %v754_v22 = vsub.f32 %v1743_v46, %v2165_v13  ;;  %v938_v34 = vsel %vm648_vm1, %v839_v49, 0.0 }
 0x17c   : > { %v762_v41 = vsub.f32 %v1815_v62, %v2165_v13  ;;  %v764_v30 = vsub.f32 %v1833_v2, %v2165_v13  ;;  %v768_v12 = vsub.f32 %v1869_v10, %v2165_v13  ;;  %v772_v2 = vsub.f32 %v1905_v18, %v2165_v13  ;;  %v2400_v10 = vld [vmem:[#allocation18_spill] sm:$0xff] }
 0x17d   : > { %v927_v5 = vadd.f32 %v926_v55, %v925_v39  ;;  %v860_v38 = vadd.f32 %v859_v52, %v810_v29  ;;  %v845_v55 = vmul.f32 %v781_v3, %v781_v3  ;;  %v818_v11 = vmul.f32 %v754_v22, %v754_v22  ;;  %v2402_v18 = vld [vmem:[#allocation22_spill] sm:$0xff] }
 0x17e   : > { %v826_v19 = vmul.f32 %v762_v41, %v762_v41  ;;  %v828_v53 = vmul.f32 %v764_v30, %v764_v30  ;;  %v832_v63 = vmul.f32 %v768_v12, %v768_v12 }
 0x17f   : > { %v929_v44 = vadd.f32 %v928_v40, %v927_v5  ;;  %v861_v39 = vadd.f32 %v860_v38, %v812_v28  ;;  %v2399_v5 = vld [vmem:[#allocation9_spill] sm:$0xff]  ;;  %v760_v40 = vsub.f32 %v1797_v58, %v2165_v13  ;;  %v944_v4 = vsel %vm648_vm1, %v845_v55, 0.0 }
 0x180   : > { %v758_v54 = vsub.f32 %v2399_v5, %v2165_v13  ;;  %v766_v58 = vsub.f32 %v1851_v6, %v2165_v13  ;;  %v774_v6 = vsub.f32 %v1931_v26, %v2165_v13 }
 0x181   : > { %v931_v16 = vadd.f32 %v930_v31, %v929_v44  ;;  %v862_v1 = vadd.f32 %v861_v39, %v814_v56  ;;  %v820_v44 = vmul.f32 %v756_v37, %v756_v37  ;;  %v946_v31 = vsel %vm648_vm1, %v847_v36, 0.0  ;;  %v2403_v56 = vld [vmem:[#allocation24_spill] sm:$0xff] }
 0x182   : > { %v822_v50 = vmul.f32 %v758_v54, %v758_v54  ;;  %v824_v59 = vmul.f32 %v760_v40, %v760_v40  ;;  %v838_v3 = vmul.f32 %v774_v6, %v774_v6  ;;  %v782_v39 = vsub.f32 %v2403_v56, %v2165_v13 }
 0x183   : > { %v933_v60 = vadd.f32 %v932_v32, %v931_v16  ;;  %v863_v46 = vadd.f32 %v862_v1, %v816_v23  ;;  %v770_v32 = vsub.f32 %v1887_v14, %v2165_v13  ;;  %v2401_v14 = vld [vmem:[#allocation20_spill] sm:$0xff] }
 0x184   : > { %v778_v38 = vsub.f32 %v2401_v14, %v2165_v13  ;;  %v846_v23 = vmul.f32 %v782_v39, %v782_v39 }
 0x185   : > { %v935_v57 = vadd.f32 %v934_v17, %v933_v60  ;;  %v864_v20 = vadd.f32 %v863_v46, %v818_v11  ;;  %v830_v60 = vmul.f32 %v766_v58, %v766_v58  ;;  %v834_v24 = vmul.f32 %v770_v32, %v770_v32 }
 0x186   : > { %v776_v17 = vsub.f32 %v2400_v10, %v2165_v13  ;;  %v842_v0 = vmul.f32 %v778_v38, %v778_v38 }
 0x187   : > { %v937_v21 = vadd.f32 %v936_v27, %v935_v57  ;;  %v865_v9 = vadd.f32 %v864_v20, %v820_v44  ;;  %v836_v57 = vmul.f32 %v772_v2, %v772_v2  ;;  %v780_v27 = vsub.f32 %v2402_v18, %v2165_v13 }
 0x189   : > { %v939_v7 = vadd.f32 %v938_v34, %v937_v21  ;;  %v866_v48 = vadd.f32 %v865_v9, %v822_v50  ;;  %v840_v21 = vmul.f32 %v776_v17, %v776_v17 }
 0x18b   : > { %v941_v25 = vadd.f32 %v940_v8, %v939_v7  ;;  %v867_v43 = vadd.f32 %v866_v48, %v824_v59  ;;  %v844_v7 = vmul.f32 %v780_v27, %v780_v27 }
 0x18d   : > { %v943_v45 = vadd.f32 %v942_v33, %v941_v25  ;;  %v868_v62 = vadd.f32 %v867_v43, %v826_v19 }
 0x18f   : > { %v945_v15 = vadd.f32 %v944_v4, %v943_v45  ;;  %v869_v35 = vadd.f32 %v868_v62, %v828_v53 }
 0x191   : > { %v947_v16 = vadd.f32 %v946_v31, %v945_v15  ;;  %v870_v29 = vadd.f32 %v869_v35, %v830_v60 }
 0x193   : > { %v948_v52 = vrot.slane %v947_v16, 4  ;;  %v871_v49 = vadd.f32 %v870_v29, %v832_v63 }
 0x195   : > { %v872_v47 = vadd.f32 %v871_v49, %v834_v24  ;;  %v949_v28 = vadd.f32 %v948_v52, %v947_v16 }
 0x197   : > { %v873_v61 = vadd.f32 %v872_v47, %v836_v57  ;;  %v950_v26 = vrot.slane %v949_v28, 2 }
 0x199   : > { %v874_v22 = vadd.f32 %v873_v61, %v838_v3  ;;  %v951_v37 = vadd.f32 %v950_v26, %v949_v28 }
 0x19b   : > { %v875_v34 = vadd.f32 %v874_v22, %v840_v21  ;;  %v952_v8 = vrot.slane %v951_v37, 1 }
 0x19d   : > { %v876_v42 = vadd.f32 %v875_v34, %v842_v0  ;;  %v953_v54 = vadd.f32 %v952_v8, %v951_v37 }
 0x19f   : > { %v877_v1 = vadd.f32 %v876_v42, %v844_v7  ;;  %v967_v46 = vrot.slane %v953_v54, 7 }
 0x1a1   : > { %v878_v55 = vadd.f32 %v877_v1, %v846_v23 }
 0x1a3   : > { %v879_v25 = vrot.slane %v878_v55, 4 }
 0x1a5   : > { %v880_v5 = vadd.f32 %v879_v25, %v878_v55 }
 0x1a7   : > { %v881_v11 = vrot.slane %v880_v5, 2 }
 0x1a9   : > { %v882_v13 = vadd.f32 %v881_v11, %v880_v5 }
 0x1ab   : > { %v883_v36 = vrot.slane %v882_v13, 1 }
 0x1ad   : > { %v884_v33 = vadd.f32 %v883_v36, %v882_v13 }
 0x1af   : > { %v968_v45 = vsel %vm957_vm2, %v884_v33, %v967_v46 }
 0x1b0   : > { %1339 = vst.msk [vmem:[%s2212_s12 + $0x1] ss:$2 sm:$0x3] %vm2206_vm3, %v968_v45 }
 0x1b1   : > { %1483 = shalt.err (!%p1480_p12)
}
 0x1b2   : > { %1383 = dma.vmem_to_hbm [thread:$0]  (%p1589_p5), %s1082_s23, 64, %s1084_s27, %s1047_s19  }
 0x1b3 PF: > { %p1393_p13 = scmp.ge.s32.totalorder %s1522_s18, 2  ;;  %s1095_s30 = sand.u32 1, %s1510_s15  }
 0x1b4   : > { %s1096_s11 = scalar_lea.sflag [#allocation3], %s1095_s30 }
 0x1b5   : > { %p1387_p0 = pnand %p1393_p13, %p1593_p6 }
 0x1b7   : > { %p1388_p1 = pneg %p1387_p0 }
 0x1b9   : > { %1501 = dma.done.wait (%p1388_p1), %s1096_s11, 4096  }
 0x1ba   : > { %1503 = vsyncadd (%p1388_p1), %s1096_s11, 4294963200  ;;  %s1114_s8 = scalar_lea.sflag [#allocation5], %s1095_s30 }
 0x1bb   : > { %1505 = dma.done.wait (%p1388_p1), %s1114_s8, 64  }
 0x1bc   : > { %1507 = vsyncadd (%p1388_p1), %s1114_s8, 4294967232  ;;  %p18_p5 = scmp.ge.s32.totalorder %s1576_s21, 4   ;;  %s2404_s15 = smov %s1514_s16 }
 0x1bd   : > { %s2405_s16 = smov %s1518_s17  ;;  %s2406_s17 = smov %s1587_s24 }
 0x1be   : > { %s2407_s18 = smov %s1576_s21  ;;  %20 = sbr.rel (!%p18_p5) target bundleno = 5 (0x5), region = 93 }
 0x1c3   :  { %1120 = vsyncpa [#allocation3], 1 }
 0x1c4   :  { %1122 = vsyncpa [#allocation3 + $0x1], 1 }
 0x1c5   :  { %1123 = vsyncpa [#allocation5], 1 }
 0x1c6   :  { %1125 = vsyncpa [#allocation5 + $0x1], 1 }

</bundles_post_ra>
